<compile_context>
chip_gen: v6e
topology: v6e:2x2x1
jax: 0.10.0
libtpu: 0.0.40
codegen_flags: <defaults>
</compile_context>

<pallas_src>
import functools

import jax
import jax.numpy as jnp
from jax.experimental import pallas as pl
from jax.experimental.pallas import tpu as pltpu


# ----------------------------- kernels ---------------------------------------


def _copy_kernel(x_ref, o_ref):
    o_ref[...] = x_ref[...]


def _relu_conv1x1_bn_kernel(x_ref, w_ref, shift_ref, o_ref):
    # x_ref:     (1, C_in, T)   channels-first, spatial axis lane-dense
    # w_ref:     (C_out, C_in)  conv weight with BN scale already folded in
    # shift_ref: (C_out, 1)     beta - running_mean * scale
    x = jnp.maximum(x_ref[0], 0.0)                                   # ReLU (VPU)
    y = jnp.dot(w_ref[...], x, preferred_element_type=jnp.float32)   # 1x1 conv (MXU)
    o_ref[0] = (y + shift_ref[...]).astype(o_ref.dtype)


# ----------------------------- wrappers ---------------------------------------


def _identity_pass(x):
    total = x.size
    if total % 128 != 0:
        # pure identity; no lane-dense view possible without padding -> just pass through
        return x

    # lane-dense 2D view: last dim a large multiple of 128
    cols = 128
    for c in (4096, 2048, 1024, 512, 256, 128):
        if total % c == 0:
            cols = c
            break
    rows = total // cols

    # keep each block (in + out, double-buffered) comfortably under v5e's 16 MiB scoped VMEM
    bytes_per_row = cols * jnp.dtype(x.dtype).itemsize
    tm_cap = max(8, ((2 * 1024 * 1024) // bytes_per_row) // 8 * 8)
    tm = rows if rows <= tm_cap else tm_cap

    x2 = x.reshape(rows, cols)
    out = pl.pallas_call(
        _copy_kernel,
        out_shape=jax.ShapeDtypeStruct((rows, cols), x.dtype),
        grid=(pl.cdiv(rows, tm),),
        in_specs=[pl.BlockSpec((tm, cols), lambda i: (i, 0))],
        out_specs=pl.BlockSpec((tm, cols), lambda i: (i, 0)),
        compiler_params=pltpu.CompilerParams(dimension_semantics=("parallel",)),
    )(x2)
    return out.reshape(x.shape)


def _relu_conv_bn(x, stride, w_oi, gamma, beta, running_mean, running_var, eps=1e-3):
    n, c_in, h, w = x.shape
    c_out = w_oi.shape[0]

    # strided spatial subsample for the 1x1 conv (padding=0).  ReLU commutes with the
    # subsample so it is applied in-kernel on the reduced tensor.
    # TODO(synk): the stride could be fused into the kernel's indexing to read HBM once.
    xs = x[:, :, ::stride, ::stride]
    ho, wo = xs.shape[2], xs.shape[3]
    hw = ho * wo
    xs = xs.reshape(n, c_in, hw)            # channels-first, spatial lane-dense; NO transpose

    # fold BN into the conv:  (W @ relu(x)) * scale + shift  ==  (scale*W) @ relu(x) + shift
    scale = gamma / jnp.sqrt(running_var + eps)                        # (C_out,)
    w_folded = (w_oi * scale[:, None]).astype(jnp.float32)             # (C_out, C_in)
    shift = (beta - running_mean * scale).reshape(c_out, 1).astype(jnp.float32)

    # spatial tile (lane dim): multiple of 128, bounded so double-buffered in+out blocks
    # stay well under the smallest scoped-VMEM budget across v5e/v6e/v7x.
    itemsize = jnp.dtype(x.dtype).itemsize
    budget = 4 * 1024 * 1024                                           # bytes per (in+out) block
    t_cap = max(128, (budget // ((c_in + c_out) * itemsize)) // 128 * 128)
    t_hw = hw if hw <= t_cap else t_cap
    grid = (n, pl.cdiv(hw, t_hw))

    out = pl.pallas_call(
        _relu_conv1x1_bn_kernel,
        out_shape=jax.ShapeDtypeStruct((n, c_out, hw), x.dtype),
        grid=grid,
        in_specs=[
            pl.BlockSpec((1, c_in, t_hw), lambda b, j: (b, 0, j)),
            pl.BlockSpec((c_out, c_in), lambda b, j: (0, 0)),
            pl.BlockSpec((c_out, 1), lambda b, j: (0, 0)),
        ],
        out_specs=pl.BlockSpec((1, c_out, t_hw), lambda b, j: (b, 0, j)),
        compiler_params=pltpu.CompilerParams(
            dimension_semantics=("parallel", "parallel")),
    )(xs, w_folded, shift)

    # (N, C_out, Ho*Wo) -> NCHW, contiguous reshape (no transpose)
    return out.reshape(n, c_out, ho, wo)


def make_identity_module(channels, stride, key):
    """Builds parameters matching Identity(channels, stride) and returns forward fn."""
    if stride == 1:
        return lambda x: _identity_pass(x)

    # ReLUConvBN(C, C, kernel_size=1, stride, padding=0) parameters
    # Conv2d weight (C_out, C_in, 1, 1), bias=False -> deterministic init
    w = jax.random.normal(key, (channels, channels), jnp.float32) * (1.0 / channels ** 0.5)
    # BatchNorm2d(affine=True) init state
    gamma = jnp.ones((channels,), jnp.float32)
    beta = jnp.zeros((channels,), jnp.float32)
    running_mean = jnp.zeros((channels,), jnp.float32)
    running_var = jnp.ones((channels,), jnp.float32)

    return functools.partial(
        _relu_conv_bn, stride=stride, w_oi=w, gamma=gamma, beta=beta,
        running_mean=running_mean, running_var=running_var, eps=1e-3)


# ----------------------------- reference (plain JAX) ---------------------------


def _reference(x, stride, w, gamma, beta, mean, var, eps=1e-3):
    if stride == 1:
        return x
    xs = jnp.maximum(x, 0.0)[:, :, ::stride, ::stride]
    y = jnp.einsum("nchw,oc->nohw", xs, w)
    inv = gamma / jnp.sqrt(var + eps)
    return y * inv[None, :, None, None] + (beta - mean * inv)[None, :, None, None]


# ----------------------------- main --------------------------------------------


if __name__ == "__main__":
    key = jax.random.PRNGKey(0)
    kx, kw = jax.random.split(key)

    N, C, H, W = 2, 4, 16, 16
    x = jax.random.normal(kx, (N, C, H, W), jnp.float32)

    # Case 1: stride == 1  -> pure identity
    fwd_id = make_identity_module(channels=C, stride=1, key=kw)
    out_id = jax.block_until_ready(fwd_id(x))
    assert out_id.shape == (N, C, H, W)
    assert jnp.allclose(out_id, x)

    # Case 2: stride == 2  -> ReLU -> 1x1 conv (stride 2) -> BatchNorm
    stride = 2
    w = jax.random.normal(kw, (C, C), jnp.float32) * (1.0 / C ** 0.5)
    gamma = jnp.ones((C,), jnp.float32)
    beta = jnp.zeros((C,), jnp.float32)
    mean = jnp.zeros((C,), jnp.float32)
    var = jnp.ones((C,), jnp.float32)

    out_s = jax.block_until_ready(
        _relu_conv_bn(x, stride, w, gamma, beta, mean, var))
    assert out_s.shape == (N, C, H // stride, W // stride)

    ref = _reference(x, stride, w, gamma, beta, mean, var)
    assert jnp.allclose(out_s, ref, atol=1e-5, rtol=1e-5), "mismatch vs JAX reference"

    print("KERNEL_OK")
</pallas_src>

<mosaic_0001>
module attributes {stable_mosaic.version = 11 : i64} {
  func.func @_copy_kernel(%arg0: i32, %arg1: memref<1x2048xf32, #tpu.memory_space<vmem>>, %arg2: memref<1x2048xf32, #tpu.memory_space<vmem>>) attributes {dimension_semantics = [#tpu.dimension_semantics<parallel>], iteration_bounds = array<i64: 1>, scalar_prefetch = 0 : i64, scratch_operands = 0 : i64, tpu.core_type = #tpu.core_type<tc>, window_params = [{transform_indices = @transform_0, window_bounds = array<i64: 1, 2048>}, {transform_indices = @transform_1, window_bounds = array<i64: 1, 2048>}]} {
    %c0 = arith.constant 0 : index
    %c0_0 = arith.constant 0 : index
    %0 = vector.load %arg1[%c0, %c0_0] : memref<1x2048xf32, #tpu.memory_space<vmem>>, vector<1x2048xf32>
    %c0_1 = arith.constant 0 : index
    %c0_2 = arith.constant 0 : index
    %1 = vector.load %arg2[%c0_1, %c0_2] : memref<1x2048xf32, #tpu.memory_space<vmem>>, vector<1x2048xf32>
    tpu.vector_store %arg2[%c0_1, %c0_2], %0 {strides = array<i32>} : memref<1x2048xf32, #tpu.memory_space<vmem>>, vector<1x2048xf32>,
    return
  }
  func.func @transform_0(%arg0: i32) -> (i32, i32) {
    %c0_i32 = arith.constant 0 : i32
    %c0_i32_0 = arith.constant 0 : i32
    return %arg0, %c0_i32 : i32, i32
  }
  func.func @transform_1(%arg0: i32) -> (i32, i32) {
    %c0_i32 = arith.constant 0 : i32
    %c0_i32_0 = arith.constant 0 : i32
    return %arg0, %c0_i32 : i32, i32
  }
}

</mosaic_0001>

<bundles_post_ra>
// kernel: tpu_custom_call.1
= control target key start
LH: loop header
LB: loop body
LE: loop exit
PB: predicated region body
PF: predicated region fallthrough
CT: control target
= control target key end

     0   :  { %6 = vsyncpa [#allocation3], 0  ;;  %s104_s0 = inlined_call_operand.hbm [shape: f32[1,2048], index: 0, kind: input, shape index: {}]   ;;  %s105_s1 = inlined_call_operand.hbm [shape: f32[1,2048], index: 1, kind: output, shape index: {}]  }
   0x1   :  { %7 = vsyncpa [#allocation4], 0  ;;  %s86_s6 = smov [#allocation2]  }
   0x2   :  { %s14_s7 = sshll.u32 %s86_s6, 4  ;;  %s15_s7 = int_to_ptr.vmem [resolvable:$true] %s14_s7 }
   0x3   :  { %s50_s8 = scalar_lea.vmem %s15_s7, 256  ;;  %p55_p1 = scmp.lt.s32.totalorder %s15_s7, %s15_s7 }
   0x4   :  { %p51_p0 = scmp.ne.s32.totalorder %s15_s7, %s50_s8  ;;  %p56_p2 = scmp.lt.s32.totalorder %s50_s8, %s50_s8 }
   0x6   :  { %p57_p3 = por %p56_p2, %p55_p1 }
   0x8   :  { %p58_p4 = pnand %p57_p3, %p51_p0 }
   0xa   :  { %61 = shalt.err (!%p58_p4)
}
   0xb   :  { %17 = dma.hbm_to_vmem [thread:$0]  %s104_s0, 256, %s15_s7, [#allocation3]  }
   0xc   :  { %82 = dma.done.wait [#allocation3], 256  }
   0xd   :  { %83 = vsyncadd [#allocation3], 4294967040  ;;  %s87_s11 = smov [#allocation5]   ;;  %v21_v0 = vld [vmem:[#allocation2] sm:$0xff]  ;;  %v22_v1 = vld [vmem:[#allocation2 + $0x8] sm:$0xff] }
   0xe   :  { %s31_s12 = sshll.u32 %s87_s11, 4  ;;  %23 = vst [vmem:[#allocation5] sm:$0xff] %v21_v0  ;;  %24 = vst [vmem:[#allocation5 + $0x8] sm:$0xff] %v22_v1  ;;  %s32_s12 = int_to_ptr.vmem [resolvable:$true] %s31_s12 }
   0xf   :  { %s62_s13 = scalar_lea.vmem %s32_s12, 256  ;;  %p67_p6 = scmp.lt.s32.totalorder %s32_s12, %s32_s12 }
  0x10   :  { %p63_p5 = scmp.ne.s32.totalorder %s32_s12, %s62_s13  ;;  %p68_p7 = scmp.lt.s32.totalorder %s62_s13, %s62_s13 }
  0x12   :  { %p69_p8 = por %p68_p7, %p67_p6 }
  0x14   :  { %p70_p9 = pnand %p69_p8, %p63_p5 }
  0x16   :  { %73 = shalt.err (!%p70_p9)
}
  0x17   :  { %34 = dma.vmem_to_hbm [thread:$0]  %s32_s12, 256, %s105_s1, [#allocation4]  }
  0x18   :  { %84 = dma.done.wait [#allocation4], 256  }
  0x19   :  { %85 = vsyncadd [#allocation4], 4294967040 }
  0x1a   :  { %38 = vsyncpa [#allocation3], 1 }
  0x1b   :  { %39 = vsyncpa [#allocation4], 1 }

</bundles_post_ra>
